<compile_context>
chip_gen: v6e
topology: v6e:2x2x1
jax: 0.10.0
libtpu: 0.0.40
codegen_flags: <defaults>
</compile_context>

<pallas_src>
import math

import jax
import jax.numpy as jnp
import numpy as np
from jax import lax
from jax.experimental import pallas as pl
from jax.experimental.pallas import tpu as pltpu


# --------------------------- per-axis bilinear weights ---------------------------
def _axis_weights(start, bsize, extent, out_dim, sr, npos):
    """Weights (out_dim, npos): 2-tap bilinear taps summed over the sr samples of each
    output bin and scaled by 1/sr.  Semantics follow torchvision roi_align
    (aligned=False).  Positions >= extent (zero padding) always get weight 0."""
    p = jnp.arange(out_dim, dtype=jnp.float32)[:, None, None]   # output bin
    s = jnp.arange(sr, dtype=jnp.float32)[None, :, None]        # sample in bin
    pos = jnp.arange(npos, dtype=jnp.float32)[None, None, :]    # feature position
    coord = start + p * bsize + (s + 0.5) * (bsize / float(sr))
    valid = (coord >= -1.0) & (coord <= extent)
    c = jnp.maximum(coord, 0.0)
    cap = extent - 1.0
    low = jnp.floor(c)
    at_edge = low >= cap
    low = jnp.minimum(low, cap)
    high = jnp.where(at_edge, cap, low + 1.0)
    c = jnp.where(at_edge, low, c)
    lw = c - low            # weight on `high`
    hw = 1.0 - lw           # weight on `low`
    w = jnp.where(pos == low, hw, 0.0) + jnp.where(pos == high, lw, 0.0)
    w = jnp.where(valid, w, 0.0)
    return jnp.sum(w, axis=1) * (1.0 / float(sr))                # (out_dim, npos)


# ----------------------------------- kernel -----------------------------------
def _roi_align_kernel(lb_ref, wy_ref, wx_ref, feat_ref, out_ref):
    # lb_ref (scalar prefetch) is only consumed by the index_maps.
    cb, hmax, wmax = feat_ref.shape
    out_h = wy_ref.shape[0]
    out_w = wx_ref.shape[0]

    feat = feat_ref[...].astype(jnp.float32)                       # (cb, hmax, wmax)
    # Small per-channel broadcasts of the per-RoI weight matrices: this turns both
    # contractions into the batched matmul forms Mosaic handles natively on the MXU.
    wy_b = jnp.broadcast_to(wy_ref[...][None], (cb, out_h, hmax))   # (cb, out_h, hmax)
    wx_b = jnp.broadcast_to(wx_ref[...][None], (cb, out_w, wmax))   # (cb, out_w, wmax)

    # H-contraction first (dominant matmul): lanes = wmax (dense), M = out_h (tiny).
    #   t[c, p, w] = sum_h wy[p, h] * feat[c, h, w]
    t = jnp.einsum('cph,chw->cpw', wy_b, feat,
                   preferred_element_type=jnp.float32,
                   precision=lax.Precision.HIGHEST)                 # (cb, out_h, wmax)
    # W-contraction (tiny): out[c, p, q] = sum_w t[c, p, w] * wx[q, w]
    out = jnp.einsum('cpw,cqw->cpq', t, wx_b,
                     preferred_element_type=jnp.float32,
                     precision=lax.Precision.HIGHEST)               # (cb, out_h, out_w)
    out_ref[...] = out.astype(out_ref.dtype)


# --------------------------- host / JAX glue (setup) ---------------------------
def _setup(features, boxes, image_shapes, canonical_scale=224, canonical_level=4,
           eps=1e-6):
    """setup_scales + convert_to_roi_format + LevelMapper."""
    orig_h = max(s[0] for s in image_shapes)
    orig_w = max(s[1] for s in image_shapes)
    scales = []
    for f in features:
        s1 = 2.0 ** round(math.log2(f.shape[2] / orig_h))
        s2 = 2.0 ** round(math.log2(f.shape[3] / orig_w))
        assert s1 == s2
        scales.append(s1)
    lvl_min = -math.log2(scales[0])
    lvl_max = -math.log2(scales[-1])

    concat_boxes = jnp.concatenate(boxes, axis=0).astype(jnp.float32)      # (K, 4)
    batch_ids = jnp.concatenate(
        [jnp.full((b.shape[0],), i, dtype=jnp.int32) for i, b in enumerate(boxes)])
    area = ((concat_boxes[:, 2] - concat_boxes[:, 0]) *
            (concat_boxes[:, 3] - concat_boxes[:, 1]))
    s = jnp.sqrt(area)
    target = jnp.floor(canonical_level + jnp.log2(s / canonical_scale + eps))
    target = jnp.clip(target, lvl_min, lvl_max)
    levels = (target - lvl_min).astype(jnp.int32)                          # (K,)
    return scales, concat_boxes, batch_ids, levels


def _pick_channel_block(C, hmax, wmax, itemsize, budget_bytes=16 * 1024 * 1024):
    """Largest divisor of C whose VMEM footprint fits the budget: double-buffered
    feature tile (2 x itemsize) plus the in-kernel f32 working copy (4 bytes)."""
    hpad = -(-hmax // 8) * 8
    wpad = -(-wmax // 128) * 128
    per_c = hpad * wpad * (2 * itemsize + 4)
    cb = C
    while cb > 1 and cb * per_c > budget_bytes:
        cb -= 1
        while C % cb:
            cb -= 1
    return cb


def multi_scale_roi_align(features, boxes, image_shapes, *, output_size,
                          sampling_ratio, channel_block=None):
    # TODO(synk): sampling_ratio <= 0 (adaptive per-RoI grid = ceil(roi/bin)) needs
    # data-dependent loop bounds; only sampling_ratio > 0 is implemented here.
    assert sampling_ratio > 0
    if isinstance(output_size, int):
        output_size = (output_size, output_size)
    out_h, out_w = output_size
    sr = int(sampling_ratio)

    N = int(features[0].shape[0])
    C = int(features[0].shape[1])
    dtype = features[0].dtype

    scales, concat_boxes, batch_ids, levels = _setup(features, boxes, image_shapes)
    K = int(concat_boxes.shape[0])

    # Sort RoIs by (level, batch) so consecutive grid steps reuse the same feature
    # block (Pallas skips the DMA when the block index does not change).
    order = jnp.argsort(levels * jnp.int32(N) + batch_ids)
    inv_order = jnp.argsort(order)
    boxes_s = concat_boxes[order]
    levels_s = levels[order]
    batch_s = batch_ids[order]

    scales_arr = jnp.asarray(scales, dtype=jnp.float32)
    hs = jnp.asarray([f.shape[2] for f in features], dtype=jnp.float32)
    ws = jnp.asarray([f.shape[3] for f in features], dtype=jnp.float32)

    sc = scales_arr[levels_s]
    x1 = boxes_s[:, 0] * sc
    y1 = boxes_s[:, 1] * sc
    x2 = boxes_s[:, 2] * sc
    y2 = boxes_s[:, 3] * sc
    roi_w = jnp.maximum(x2 - x1, 1.0)
    roi_h = jnp.maximum(y2 - y1, 1.0)
    bin_h = roi_h / out_h
    bin_w = roi_w / out_w
    h_lvl = hs[levels_s]
    w_lvl = ws[levels_s]

    hmax = max(int(f.shape[2]) for f in features)
    wmax = max(int(f.shape[3]) for f in features)

    # Precompute the separable bilinear weight matrices (hoists all VPU/scalar work
    # out of the serial grid loop).  1/(sr*sr) is folded in as 1/sr per axis.
    wy = jax.vmap(lambda s0, b, e: _axis_weights(s0, b, e, out_h, sr, hmax))(
        y1, bin_h, h_lvl)                                        # (K, out_h, hmax)
    wx = jax.vmap(lambda s0, b, e: _axis_weights(s0, b, e, out_w, sr, wmax))(
        x1, bin_w, w_lvl)                                        # (K, out_w, wmax)

    # (level, batch) lookup table for the feature index_map; (2, K) keeps the long
    # axis last for SMEM layout.
    lb = jnp.stack([levels_s, batch_s], axis=0).astype(jnp.int32)

    # TODO(synk): stacking zero-padded levels inflates HBM/DMA for coarse levels; a
    # per-level pallas_call (host-side RoI grouping) would avoid that padding.
    feats = jnp.stack([
        jnp.pad(f, ((0, 0), (0, 0), (0, hmax - f.shape[2]), (0, wmax - f.shape[3])))
        for f in features])                                      # (L, N, C, hmax, wmax)

    cb = channel_block or _pick_channel_block(C, hmax, wmax, jnp.dtype(dtype).itemsize)
    assert C % cb == 0
    num_cblk = C // cb

    grid_spec = pltpu.PrefetchScalarGridSpec(
        num_scalar_prefetch=1,
        grid=(num_cblk, K),                      # c outer, RoI inner -> feature DMA dedup
        in_specs=[
            pl.BlockSpec((None, out_h, hmax), lambda c, i, lb: (i, 0, 0)),
            pl.BlockSpec((None, out_w, wmax), lambda c, i, lb: (i, 0, 0)),
            pl.BlockSpec((None, None, cb, hmax, wmax),
                         lambda c, i, lb: (lb[0, i], lb[1, i], c, 0, 0)),
        ],
        out_specs=pl.BlockSpec((None, cb, out_h, out_w),
                               lambda c, i, lb: (i, c, 0, 0)),
    )

    pooled = pl.pallas_call(
        _roi_align_kernel,
        out_shape=jax.ShapeDtypeStruct((K, C, out_h, out_w), dtype),
        grid_spec=grid_spec,
        compiler_params=pltpu.CompilerParams(
            dimension_semantics=("parallel", "parallel"),
            vmem_limit_bytes=32 * 1024 * 1024),
    )(lb, wy, wx, feats)

    return pooled[inv_order]                                     # restore input order


# ----------------------- independent numpy reference -----------------------
def _bilinear_np(fmap, y, x):
    C, H, W = fmap.shape
    if y < -1.0 or y > H or x < -1.0 or x > W:
        return np.zeros(C, np.float64)
    y = max(y, 0.0)
    x = max(x, 0.0)
    y_low, x_low = int(y), int(x)
    if y_low >= H - 1:
        y_high = y_low = H - 1
        y = float(y_low)
    else:
        y_high = y_low + 1
    if x_low >= W - 1:
        x_high = x_low = W - 1
        x = float(x_low)
    else:
        x_high = x_low + 1
    ly, lx = y - y_low, x - x_low
    hy, hx = 1.0 - ly, 1.0 - lx
    return (hy * hx * fmap[:, y_low, x_low] + hy * lx * fmap[:, y_low, x_high] +
            ly * hx * fmap[:, y_high, x_low] + ly * lx * fmap[:, y_high, x_high])


def _multi_scale_roi_align_ref(features, concat_boxes, batch_ids, levels, scales,
                               out_h, out_w, sr):
    feats_np = [np.asarray(f, dtype=np.float64) for f in features]
    boxes = np.asarray(concat_boxes, dtype=np.float32)
    batch_ids = np.asarray(batch_ids)
    levels = np.asarray(levels)
    K = boxes.shape[0]
    C = feats_np[0].shape[1]
    out = np.zeros((K, C, out_h, out_w), dtype=np.float64)
    for k in range(K):
        lvl, b = int(levels[k]), int(batch_ids[k])
        fmap = feats_np[lvl][b]
        scale = np.float32(scales[lvl])
        x1, y1, x2, y2 = (boxes[k] * scale).astype(np.float32)
        rw = max(float(x2) - float(x1), 1.0)
        rh = max(float(y2) - float(y1), 1.0)
        bh, bw = rh / out_h, rw / out_w
        for ph in range(out_h):
            for pw in range(out_w):
                acc = np.zeros(C, np.float64)
                for iy in range(sr):
                    yy = float(y1) + ph * bh + (iy + 0.5) * bh / sr
                    for ix in range(sr):
                        xx = float(x1) + pw * bw + (ix + 0.5) * bw / sr
                        acc += _bilinear_np(fmap, yy, xx)
                out[k, :, ph, pw] = acc / (sr * sr)
    return out


if __name__ == "__main__":
    key = jax.random.PRNGKey(0)
    k_f0, k_f1, k_jit = jax.random.split(key, 3)
    N, C = 2, 4
    # Two FPN levels: 32x32 (scale 1/2) and 16x16 (scale 1/4) for 64x64 images.
    feat0 = jax.random.normal(k_f0, (N, C, 32, 32), dtype=jnp.float32)
    feat1 = jax.random.normal(k_f1, (N, C, 16, 16), dtype=jnp.float32)
    features = [feat0, feat1]
    image_shapes = [(64, 64), (64, 64)]

    # 3 boxes per image, mixing big boxes (-> coarse level) and small (-> fine level).
    base = jnp.asarray(
        [[[1.0, 2.0, 62.0, 61.0],
          [5.0, 6.0, 20.0, 19.0],
          [8.0, 4.0, 50.0, 48.0]],
         [[1.0, 1.0, 62.0, 60.0],
          [12.0, 10.0, 30.0, 26.0],
          [3.0, 7.0, 15.0, 22.0]]], dtype=jnp.float32)
    jitter = jax.random.uniform(k_jit, base.shape, minval=0.0, maxval=2.0)
    boxes_all = base + jitter
    boxes = [boxes_all[0], boxes_all[1]]

    out = multi_scale_roi_align(features, boxes, image_shapes,
                                output_size=3, sampling_ratio=2)
    out = jax.block_until_ready(out)

    # Check against the independent numpy reference (same level assignment/scales).
    scales, concat_boxes, batch_ids, levels = _setup(features, boxes, image_shapes)
    ref = _multi_scale_roi_align_ref(features, concat_boxes, batch_ids, levels,
                                     scales, 3, 3, 2)
    np.testing.assert_allclose(np.asarray(out), ref, rtol=1e-4, atol=1e-4)
    print("KERNEL_OK")
</pallas_src>

<mosaic_0001>
module attributes {stable_mosaic.version = 11 : i64} {
  func.func @_roi_align_kernel(%arg0: i32, %arg1: i32, %arg2: memref<2x6xi32, #tpu.memory_space<smem>>, %arg3: memref<1x3x32xf32, #tpu.memory_space<vmem>>, %arg4: memref<1x3x32xf32, #tpu.memory_space<vmem>>, %arg5: memref<1x1x4x32x32xf32, #tpu.memory_space<vmem>>, %arg6: memref<1x4x3x3xf32, #tpu.memory_space<vmem>>) attributes {dimension_semantics = [#tpu.dimension_semantics<parallel>, #tpu.dimension_semantics<parallel>], iteration_bounds = array<i64: 1, 6>, scalar_prefetch = 1 : i64, scratch_operands = 0 : i64, tpu.core_type = #tpu.core_type<tc>, window_params = [{transform_indices = @transform_0, window_bounds = array<i64: 1, 3, 32>}, {transform_indices = @transform_1, window_bounds = array<i64: 1, 3, 32>}, {transform_indices = @transform_2, window_bounds = array<i64: 1, 1, 4, 32, 32>}, {transform_indices = @transform_3, window_bounds = array<i64: 1, 4, 3, 3>}]} {
    %c0 = arith.constant 0 : index
    %c0_0 = arith.constant 0 : index
    %c0_1 = arith.constant 0 : index
    %c0_2 = arith.constant 0 : index
    %c0_3 = arith.constant 0 : index
    %0 = vector.load %arg5[%c0, %c0_0, %c0_1, %c0_2, %c0_3] : memref<1x1x4x32x32xf32, #tpu.memory_space<vmem>>, vector<1x1x4x32x32xf32>
    %1 = vector.shape_cast %0 : vector<1x1x4x32x32xf32> to vector<4x32x32xf32>
    %c0_4 = arith.constant 0 : index
    %c0_5 = arith.constant 0 : index
    %c0_6 = arith.constant 0 : index
    %2 = vector.load %arg3[%c0_4, %c0_5, %c0_6] : memref<1x3x32xf32, #tpu.memory_space<vmem>>, vector<1x3x32xf32>
    %3 = vector.shape_cast %2 : vector<1x3x32xf32> to vector<3x32xf32>
    %4 = vector.shape_cast %3 : vector<3x32xf32> to vector<1x3x32xf32>
    %5 = vector.shape_cast %4 : vector<1x3x32xf32> to vector<1x3x32xf32>
    %6 = vector.broadcast %5 : vector<1x3x32xf32> to vector<4x3x32xf32>
    %c0_7 = arith.constant 0 : index
    %c0_8 = arith.constant 0 : index
    %c0_9 = arith.constant 0 : index
    %7 = vector.load %arg4[%c0_7, %c0_8, %c0_9] : memref<1x3x32xf32, #tpu.memory_space<vmem>>, vector<1x3x32xf32>
    %8 = vector.shape_cast %7 : vector<1x3x32xf32> to vector<3x32xf32>
    %9 = vector.shape_cast %8 : vector<3x32xf32> to vector<1x3x32xf32>
    %10 = vector.shape_cast %9 : vector<1x3x32xf32> to vector<1x3x32xf32>
    %11 = vector.broadcast %10 : vector<1x3x32xf32> to vector<4x3x32xf32>
    "tpu.trace_start"() <{level = 10 : i32, message = "cph,chw->cpw"}> : () -> ()
    %cst = arith.constant dense<0.000000e+00> : vector<4x3x32xf32>
    %12 = tpu.matmul %6, %1, %cst {dimension_numbers = #tpu.dot_dimension_numbers<[2], [1], [1], [2], [0, 0, 0, 1, 1, 2], [0], [0]>, precision = #tpu.contract_precision<fp32>} : vector<4x3x32xf32>, vector<4x32x32xf32>, vector<4x3x32xf32> -> vector<4x3x32xf32>
    "tpu.trace_stop"() : () -> ()
    "tpu.trace_start"() <{level = 10 : i32, message = "cpw,cqw->cpq"}> : () -> ()
    %cst_10 = arith.constant dense<0.000000e+00> : vector<4x3x3xf32>
    %13 = tpu.matmul %12, %11, %cst_10 {dimension_numbers = #tpu.dot_dimension_numbers<[2], [2], [1], [1], [0, 0, 0, 1, 1, 1], [0], [0]>, precision = #tpu.contract_precision<fp32>} : vector<4x3x32xf32>, vector<4x3x32xf32>, vector<4x3x3xf32> -> vector<4x3x3xf32>
    "tpu.trace_stop"() : () -> ()
    %c0_11 = arith.constant 0 : index
    %c0_12 = arith.constant 0 : index
    %c0_13 = arith.constant 0 : index
    %c0_14 = arith.constant 0 : index
    %14 = vector.load %arg6[%c0_11, %c0_12, %c0_13, %c0_14] : memref<1x4x3x3xf32, #tpu.memory_space<vmem>>, vector<1x4x3x3xf32>
    %15 = vector.shape_cast %14 : vector<1x4x3x3xf32> to vector<4x3x3xf32>
    %16 = vector.shape_cast %13 : vector<4x3x3xf32> to vector<1x4x3x3xf32>
    tpu.vector_store %arg6[%c0_11, %c0_12, %c0_13, %c0_14], %16 {strides = array<i32>} : memref<1x4x3x3xf32, #tpu.memory_space<vmem>>, vector<1x4x3x3xf32>,
    return
  }
  func.func @transform_0(%arg0: i32, %arg1: i32, %arg2: memref<2x6xi32, #tpu.memory_space<smem>>) -> (i32, i32, i32) {
    %c0_i32 = arith.constant 0 : i32
    %c0_i32_0 = arith.constant 0 : i32
    %c0_i32_1 = arith.constant 0 : i32
    return %arg1, %c0_i32, %c0_i32_0 : i32, i32, i32
  }
  func.func @transform_1(%arg0: i32, %arg1: i32, %arg2: memref<2x6xi32, #tpu.memory_space<smem>>) -> (i32, i32, i32) {
    %c0_i32 = arith.constant 0 : i32
    %c0_i32_0 = arith.constant 0 : i32
    %c0_i32_1 = arith.constant 0 : i32
    return %arg1, %c0_i32, %c0_i32_0 : i32, i32, i32
  }
  func.func @transform_2(%arg0: i32, %arg1: i32, %arg2: memref<2x6xi32, #tpu.memory_space<smem>>) -> (i32, i32, i32, i32, i32) {
    %c0 = arith.constant 0 : index
    %0 = arith.index_cast %arg1 : i32 to index
    %1 = memref.load %arg2[%c0, %0] : memref<2x6xi32, #tpu.memory_space<smem>>
    %c1 = arith.constant 1 : index
    %2 = arith.index_cast %arg1 : i32 to index
    %3 = memref.load %arg2[%c1, %2] : memref<2x6xi32, #tpu.memory_space<smem>>
    %c0_i32 = arith.constant 0 : i32
    %c0_i32_0 = arith.constant 0 : i32
    %c0_i32_1 = arith.constant 0 : i32
    return %1, %3, %arg0, %c0_i32, %c0_i32_0 : i32, i32, i32, i32, i32
  }
  func.func @transform_3(%arg0: i32, %arg1: i32, %arg2: memref<2x6xi32, #tpu.memory_space<smem>>) -> (i32, i32, i32, i32) {
    %c0_i32 = arith.constant 0 : i32
    %c0_i32_0 = arith.constant 0 : i32
    %c0_i32_1 = arith.constant 0 : i32
    return %arg1, %arg0, %c0_i32, %c0_i32_0 : i32, i32, i32, i32
  }
}

</mosaic_0001>

<bundles_post_ra>
// kernel: tpu_custom_call.1
= control target key start
LH: loop header
LB: loop body
LE: loop exit
PB: predicated region body
PF: predicated region fallthrough
CT: control target
= control target key end

     0   :  { %s5104_s15 = smov [#allocation3]   ;;  %s5904_s0 = inlined_call_operand.hbm [shape: s32[2,6], index: 0, kind: input, shape index: {}]   ;;  %s5905_s1 = inlined_call_operand.hbm [shape: f32[6,3,32], index: 1, kind: input, shape index: {}]   ;;  %s5906_s2 = inlined_call_operand.hbm [shape: f32[6,3,32], index: 2, kind: input, shape index: {}]   ;;  %s5907_s3 = inlined_call_operand.hbm [shape: f32[2,2,4,32,32], index: 3, kind: input, shape index: {}]   ;;  %s5908_s4 = inlined_call_operand.vmem [shape: f32[6,4,3,3], index: 4, kind: output, shape index: {}]  }
   0x1   :  { %5913 = sst [smem:[#allocation18_spill]] %s5906_s2 }
   0x2   :  { %5914 = sst [smem:[#allocation19_spill]] %s5908_s4 }
   0x3   :  { %10 = dma.hbm_to_smem %s5904_s0, 32, %s5104_s15, [#allocation2] }
   0x4   :  { %5054 = dma.done.wait [#allocation2], 32 }
   0x5   :  { %5055 = vsyncadd [#allocation2], 4294967264 }
   0x6   :  { %12 = sfence }
   0x7   :  { %13 = vsyncpa [#allocation5], 0 }
   0x8   :  { %15 = vsyncpa [#allocation5 + $0x1], 0 }
   0x9   :  { %16 = vsyncpa [#allocation7], 0 }
   0xa   :  { %18 = vsyncpa [#allocation7 + $0x1], 0  ;;  %s5140_s18 = smov 0   ;;  %s5142_s19 = smov 0  }
   0xb   :  { %s5144_s20 = smov 0   ;;  %s5146_s21 = smov 0  }
   0xc   :  { %s5148_s22 = smov 0   ;;  %s5150_s23 = smov 0  }
   0xd   :  { %s5152_s0 = smov 0   ;;  %s5154_s24 = smov 0  }
   0xe   :  { %s5156_s25 = smov 0  }
   0xf LB: > { %s33_s26 = sadd.s32 1, %s5098_s24  ;;  %s5909_s27 = sadd.s32 4294967295, %s5102_s25   ;;  %s5102_s25 = sphi %s5156_s25, %s24_s25   ;;  %s5098_s24 = sphi %s5154_s24, %s5937_s24   ;;  %s5094_s0 = sphi %s5152_s0, %s5936_s0   ;;  %s5090_s23 = sphi %s5150_s23, %s5935_s23   ;;  %s5086_s22 = sphi %s5148_s22, %s5934_s22   ;;  %s5082_s21 = sphi %s5146_s21, %s5933_s21   ;;  %s5078_s20 = sphi %s5144_s20, %s5932_s20   ;;  %s5074_s19 = sphi %s5142_s19, %s5931_s19   ;;  %s5070_s18 = sphi %s5140_s18, %s5930_s18  }
  0x10   : > { %p34_p0 = scmp.ge.s32.totalorder %s33_s26, 6  ;;  %s43_s28 = sadd.s32 1, %s5090_s23 }
  0x11   : > { %p50_p1 = scmp.ne.s32.totalorder %s5090_s23, %s5086_s22  ;;  %p51_p2 = scmp.eq.s32.totalorder %s5102_s25, 0 }
  0x12   : > { %s5939_s26 = smov (%p34_p0, %s33_s26), 0  ;;  %p56_p3 = scmp.ne.s32.totalorder %s5086_s22, %s5082_s21 }
  0x13   : > { %s40_s29 = ssub.s32 %s5098_s24, %s5939_s26  ;;  %p57_p4 = scmp.eq.s32.totalorder %s5909_s27, 0 }
  0x14   : > { %p41_p5 = scmp.eq.s32.totalorder %s40_s29, 0  ;;  %p52_p6 = por %p51_p2, %p50_p1 }
  0x15   : > { %p5194_p7 = por %p57_p4, %p56_p3  ;;  %s5199_s5 = sld [smem:[#allocation3 + %s5098_s24]] }
  0x16   : > { %s5202_s6 = scalar_select %p41_p5, %s5090_s23, %s43_s28  }
  0x17   : > { %s5915_s30 = scalar_select %p5194_p7, 1, 0 }
  0x18   : > { %5916 = sst [smem:[#allocation17_spill]] %s5202_s6  ;;  %p124_p8 = scmp.ne.s32.totalorder %s5078_s20, %s5074_s19 }
  0x19   : > { %p130_p9 = scmp.ne.s32.totalorder %s5074_s19, %s5070_s18  ;;  %p4848_p10 = scmp.lt.s32.totalorder %s5102_s25, 6 }
  0x1a   : > { %p5208_p11 = por %p124_p8, %p51_p2  ;;  %s5910_s9 = sand.u32 1, %s5090_s23  }
  0x1b   : > { %p5212_p12 = por %p130_p9, %p57_p4  ;;  %s4249_s10 = sshll.u32 %s5098_s24, 6 }
  0x1c   : > { %s4248_s11 = sshll.u32 %s5910_s9, 2  ;;  %p5222_p13 = pnand %p4848_p10, %p52_p6 }
  0x1d   : > { %s5918_s8 = scalar_select %p5212_p12, 1, 0 }
  0x1e   : > { %s200_s13 = sand.u32 1, %s5102_s25   ;;  %s5920_s2 = sld [smem:[#allocation18_spill]] }
  0x1f   : > { %s204_s17 = scalar_lea.vmem [#allocation6], %s4248_s11  ;;  %p4257_p0 = scmp.ge.s32.totalorder %s5102_s25, 1 }
  0x20   : > { %s211_s18 = sshll.u32 %s204_s17, 4  ;;  %s5231_s21 = scalar_lea.sflag [#allocation7], %s200_s13  ;;  %s212_s18 = int_to_ptr.vmem [resolvable:$true] %s211_s18 }
  0x21   : > { %p4936_p1 = pneg %p5222_p13  ;;  %s4947_s28 = scalar_lea.vmem %s212_s18, 64 }
  0x22   : > { %p4948_p2 = scmp.ne.s32.totalorder %s212_s18, %s4947_s28  ;;  %s5105_s29 = smov [#allocation6]  }
  0x23   : > { %s4952_s27 = sshll.u32 %s5105_s29, 4  ;;  %s4953_s27 = int_to_ptr.vmem [resolvable:$false] %s4952_s27 }
  0x24   : > { %s209_s16 = scalar_lea.hbm %s5920_s2, %s4249_s10  ;;  %p4950_p3 = pnand %p4948_p2, %p4936_p1 }
  0x25   : > { %s4954_s9 = scalar_lea.vmem %s4953_s27, 128  ;;  %p4955_p5 = scmp.lt.s32.totalorder %s212_s18, %s4953_s27 }
  0x26   : > { %p4951_p4 = pneg %p4950_p3  ;;  %p4956_p6 = scmp.lt.s32.totalorder %s4954_s9, %s4947_s28 }
  0x28   : > { %p4957_p8 = por %p4956_p6, %p4955_p5 }
  0x2a   : > { %p4958_p9 = pnand %p4957_p8, %p4951_p4 }
  0x2c   : > { %4961 = shalt.err (!%p4958_p9)
}
  0x2d   : > { %4840 = dma.hbm_to_vmem [thread:$0]  (!%p5222_p13), %s209_s16, 64, %s212_s18, %s5231_s21  }
  0x2e   : > { %p251_p2 = scmp.lt.s32.totalorder %s5102_s25, 7  ;;  %s191_s14 = scalar_lea.hbm %s5905_s1, %s4249_s10 }
  0x2f   : > { %s186_s15 = scalar_lea.vmem [#allocation4], %s4248_s11  ;;  %s93_s28 = sshra.s32 %s5098_s24, 7 }
  0x30   : > { %p5244_p3 = pnand %p4257_p0, %p251_p2  ;;  %s193_s17 = sshll.u32 %s186_s15, 4  ;;  %s194_s17 = int_to_ptr.vmem [resolvable:$true] %s193_s17 }
  0x31   : > { %s5922_s29 = sand.u32 1, %s5090_s23   ;;  %s4975_s6 = scalar_lea.vmem %s194_s17, 64 }
  0x32   : > { %s5921_s13 = scalar_select %p5244_p3, 1, 0 }
  0x33   : > { %s183_s2 = scalar_lea.sflag [#allocation5], %s5922_s29  ;;  %p4976_p4 = scmp.ne.s32.totalorder %s194_s17, %s4975_s6 }
  0x34   : > { %s5106_s16 = smov [#allocation4]  }
  0x35   : > { %p4978_p5 = pnand %p4976_p4, %p4936_p1  ;;  %s4980_s18 = sshll.u32 %s5106_s16, 4  ;;  %s4981_s18 = int_to_ptr.vmem [resolvable:$false] %s4980_s18 }
  0x36   : > { %s4982_s4 = scalar_lea.vmem %s4981_s18, 128  ;;  %p4983_p0 = scmp.lt.s32.totalorder %s194_s17, %s4981_s18 }
  0x37   : > { %p4979_p6 = pneg %p4978_p5  ;;  %p4984_p8 = scmp.lt.s32.totalorder %s4982_s4, %s4975_s6 }
  0x39   : > { %p4985_p9 = por %p4984_p8, %p4983_p0 }
  0x3b   : > { %p4986_p2 = pnand %p4985_p9, %p4979_p6 }
  0x3d   : > { %4989 = shalt.err (!%p4986_p2)
}
  0x3e   : > { %4837 = dma.hbm_to_vmem [thread:$0]  (!%p5222_p13), %s191_s14, 64, %s194_s17, %s183_s2  }
  0x3f   : > { %s4265_s10 = sshll.u32 %s93_s28, 7  ;;  %s98_s11 = sand.u32 127, %s5098_s24 }
  0x40   : > { %s4266_s4 = sadd.s32 128, %s4265_s10  ;;  %s101_s6 = sld [smem:[#allocation3 + %s5939_s26]] }
  0x41   : > { %s99_s27 = sadd.s32 %s4266_s4, %s98_s11  ;;  %s102_s9 = sshra.s32 %s5939_s26, 7 }
  0x42   : > { %s100_s12 = sld [smem:[#allocation3 + %s99_s27]]  ;;  %s4267_s15 = sshll.u32 %s102_s9, 7 }
  0x43   : > { %s4268_s29 = sadd.s32 128, %s4267_s15  ;;  %s107_s16 = sand.u32 127, %s5939_s26 }
  0x44   : > { %s108_s18 = sadd.s32 %s4268_s29, %s107_s16  ;;  %s220_s17 = sand.u32 1, %s5078_s20  }
  0x45   : > { %s109_s2 = sld [smem:[#allocation3 + %s108_s18]]  ;;  %s117_s11 = sadd.s32 1, %s5078_s20 }
  0x46   : > { %s110_s14 = ssub.s32 %s5199_s5, %s101_s6  ;;  %s4252_s15 = sshll.u32 %s220_s17, 7 }
  0x47   : > { %s4826_s28 = scalar_select %p5208_p11, [#allocation3], [#allocation9] }
  0x48   : > { %s4827_s10 = scalar_select %p5208_p11, %s5098_s24, 0 }
  0x49   : > { %s5941_s28 = smov (!%p4848_p10, %s4826_s28), [#allocation11]  ;;  %s5945_s27 = smov (!%p5208_p11, %s99_s27), 0 }
  0x4a   : > { %s5943_s10 = smov (!%p4848_p10, %s4827_s10), 0  ;;  %s5949_s27 = smov (!%p4848_p10, %s5945_s27), 0 }
  0x4b   : > { %s111_s4 = ssub.s32 %s100_s12, %s109_s2  ;;  %s223_s29 = sld [smem:[%s5941_s28 + %s5943_s10]] }
  0x4c   : > { %s112_s9 = sor.u32 %s111_s4, %s110_s14  ;;  %p5290_p1 = pnand %p4848_p10, %p5208_p11 }
  0x4d   : > { %p115_p13 = scmp.eq.s32.totalorder %s112_s9, 0  ;;  %s222_s18 = scalar_lea.vmem [#allocation8], %s4252_s15 }
  0x4e   : > { %s4828_s5 = scalar_select %p5208_p11, [#allocation3], [#allocation10] }
  0x4f   : > { %s5278_s6 = scalar_select %p115_p13, %s5078_s20, %s117_s11  }
  0x50   : > { %s5947_s5 = smov (!%p4848_p10, %s4828_s5), [#allocation12]  ;;  %s243_s2 = sshll.u32 %s222_s18, 4  ;;  %s5294_s2 = int_to_ptr.vmem [resolvable:$true] %s243_s2 }
  0x51   : > { %s231_s12 = sld [smem:[%s5947_s5 + %s5949_s27]]  ;;  %s4255_s14 = sshll.u32 %s223_s29, 5 }
  0x52   : > { %p4992_p11 = pneg %p5290_p1  ;;  %s4995_s29 = scalar_lea.hbm %s5907_s3, 8192 }
  0x57   : > { %s4254_s17 = sshll.u32 %s231_s12, 4 }
  0x58   : > { %s240_s28 = sadd.s32 %s4255_s14, %s4254_s17 }
  0x59   : > { %s4256_s10 = sshll.u32 %s240_s28, 7 }
  0x5a   : > { %s5299_s9 = scalar_lea.hbm %s5907_s3, %s4256_s10 }
  0x5b   : > { %s4990_s7 = scalar_lea.hbm %s5299_s9, 2048  ;;  %p4996_p6 = scmp.lt.s32.totalorder %s5299_s9, %s5907_s3 }
  0x5c   : > { %p4991_p10 = scmp.ne.s32.totalorder %s5299_s9, %s4990_s7  ;;  %p4997_p0 = scmp.lt.s32.totalorder %s4995_s29, %s4990_s7 }
  0x5e   : > { %p4993_p4 = pnand %p4992_p11, %p4991_p10  ;;  %p4998_p8 = por %p4997_p0, %p4996_p6 }
  0x60   : > { %p4994_p5 = pneg %p4993_p4 }
  0x62   : > { %p4999_p9 = pnand %p4998_p8, %p4994_p5 }
  0x64   : > { %5002 = shalt.err (!%p4999_p9)
}
  0x65   : > { %s5003_s18 = scalar_lea.vmem %s5294_s2, 2048  ;;  %s5107_s14 = smov [#allocation8]  }
  0x66   : > { %p5004_p2 = scmp.ne.s32.totalorder %s5294_s2, %s5003_s18  ;;  %s5008_s17 = sshll.u32 %s5107_s14, 4  ;;  %s5009_s17 = int_to_ptr.vmem [resolvable:$false] %s5008_s17 }
  0x67   : > { %s5010_s28 = scalar_lea.vmem %s5009_s17, 4096  ;;  %p5011_p4 = scmp.lt.s32.totalorder %s5294_s2, %s5009_s17 }
  0x68   : > { %p5006_p13 = pnand %p5004_p2, %p4992_p11  ;;  %p5012_p12 = scmp.lt.s32.totalorder %s5010_s28, %s5003_s18 }
  0x6a   : > { %p5007_p10 = pneg %p5006_p13  ;;  %p5013_p7 = por %p5012_p12, %p5011_p4 }
  0x6c   : > { %p5014_p3 = pnand %p5013_p7, %p5007_p10 }
  0x6e   : > { %5017 = shalt.err (!%p5014_p3)
}
  0x6f   : > { %s5108_s10 = smov 128   ;;  %s5109_s11 = smov 8  }
  0x70   : > { %4847 = dma.hbm_to_vmem [thread:$0]  (!%p5290_p1), %s5299_s9, 2048, %s5294_s2, %s5231_s21, %s5108_s10, %s5108_s10, %s5109_s11  }
  0x71   : > { %p5924_p11 = scmp.ne.s32.totalorder %s5921_s13, 0 }
  0x72   : > { %s257_s4 = sand.u32 (!%p5924_p11), 1, %s5086_s22   ;;  %p5925_p7 = scmp.ne.s32.totalorder (!%p5924_p11), %s5915_s30, 0 }
  0x73   : > { %255 = sbr.rel (%p5924_p11) target bundleno = 669 (0x29d), region = 32  ;;  %s5323_s7 = sshll.u32 (!%p5924_p11), %s257_s4, 2 }
  0x74   : > { %s258_s27 = scalar_lea.sflag (!%p5924_p11), [#allocation5], %s257_s4  ;;  %s261_s15 = scalar_lea.vmem (!%p5924_p11), [#allocation4], %s5323_s7 }
  0x78   : > { %5057 = dma.done.wait (%p5925_p7), %s258_s27, 64  }
  0x79   : > { %5059 = vsyncadd (%p5925_p7), %s258_s27, 4294967232  ;;  %s5926_s29 = sadd.s32 4294967295, %s5102_s25   ;;  %s270_s16 = scalar_lea.vmem [#allocation6], %s5323_s7 }
  0x7a   : > { %s266_s21 = sand.u32 1, %s5926_s29  }
  0x7b   : > { %s267_s13 = scalar_lea.sflag [#allocation7], %s266_s21 }
  0x7c   : > { %5061 = dma.done.wait (%p5925_p7), %s267_s13, 64  }
  0x7d   : > { %5063 = vsyncadd (%p5925_p7), %s267_s13, 4294967232  ;;  %s277_s2 = sand.u32 1, %s5074_s19   ;;  %p5927_p12 = scmp.ne.s32.totalorder %s5918_s8, 0 }
  0x7e   : > { %s4260_s9 = sshll.u32 %s277_s2, 7 }
  0x7f   : > { %s5338_s5 = scalar_lea.vmem [#allocation8], %s4260_s9 }
  0x80   : > { %5065 = dma.done.wait (%p5927_p12), %s267_s13, 2048  }
  0x81   : > { %5067 = vsyncadd (%p5927_p12), %s267_s13, 4294965248  ;;  %v5110_v0 = vmov 0.0   ;;  %vm5111_vm0 = vmmov 0   ;;  %vm354_vm1 = vcmask 261120   ;;  %v339_v1 = vld [vmem:[%s5338_s5 + $0x18] sm:$0xff]  ;;  %v338_v2 = vld [vmem:[%s5338_s5 + $0x10] sm:$0xff] }
  0x82   : > { %4440 = vmatprep.subr.mxu0 %v5110_v0  ;;  %4451 = vmatprep.subr.mxu1 %v5110_v0  ;;  %v337_v3 = vld [vmem:[%s5338_s5 + $0x8] sm:$0xff]  ;;  %v5353_v4 = vand.u32 4294901760, %v339_v1  ;;  %v5355_v5 = vand.u32 4294901760, %v338_v2  ;;  %v336_v7 = vld [vmem:[%s5338_s5] sm:$0xff]  ;;  %v352_v8 = vld [vmem:[%s261_s15] sm:$0x7] }
  0x83   : > { %4448 = vmatprep.mubr.msk.f32.mxu0 %vm5111_vm0, %v5110_v0  ;;  %4459 = vmatprep.mubr.msk.f32.mxu1 %vm5111_vm0, %v5110_v0  ;;  %v5357_v6 = vand.u32 4294901760, %v337_v3  ;;  %v5360_v9 = vand.u32 4294901760, %v336_v7  ;;  %v356_v10 = vsel %vm354_vm1, %v352_v8, 0  ;;  %v343_v32 = vld [vmem:[%s5338_s5 + $0x38] sm:$0xff]  ;;  %v342_v34 = vld [vmem:[%s5338_s5 + $0x30] sm:$0xff]  ;;  %v341_v35 = vld [vmem:[%s5338_s5 + $0x28] sm:$0xff] }
  0x84   : > { %4441 = vmatpush3.msra.mxu0 %v5353_v4  ;;  %v463_v11 = vsub.f32 %v339_v1, %v5353_v4  ;;  %v5365_v12 = vand.u32 4294901760, %v356_v10  ;;  %v470_v13 = vsub.f32 %v338_v2, %v5355_v5  ;;  %v5411_v33 = vand.u32 4294901760, %v343_v32  ;;  %v340_v38 = vld [vmem:[%s5338_s5 + $0x20] sm:$0xff]  ;;  %v347_v56 = vld [vmem:[%s5338_s5 + $0x58] sm:$0xff]  ;;  %v346_v58 = vld [vmem:[%s5338_s5 + $0x50] sm:$0xff]  ;;  %p327_p3 = scmp.lt.s32.totalorder %s5094_s0, 5 }
  0x85   : > { %v5369_v14 = vsub.f32 %v337_v3, %v5357_v6  ;;  %4442 = vmatprep.subr.mxu0 %v5110_v0  ;;  %v5373_v15 = vsub.f32 %v336_v7, %v5360_v9  ;;  %v5420_v36 = vand.u32 4294901760, %v342_v34  ;;  %v5429_v39 = vand.u32 4294901760, %v341_v35  ;;  %v345_v59 = vld [vmem:[%s5338_s5 + $0x48] sm:$0xff]  ;;  %v344_v62 = vld [vmem:[%s5338_s5 + $0x40] sm:$0xff]  ;;  %s5928_s18 = sld [smem:[#allocation19_spill]] }
  0x86   : > { %4443 = vmatpush3.msra.mxu0 %v5355_v5  ;;  %v464_v16 = vand.u32 4294901760, %v463_v11  ;;  %v5377_v17 = vsub.f32 %v356_v10, %v5365_v12  ;;  %v471_v18 = vand.u32 4294901760, %v470_v13  ;;  %v5425_v37 = vsub.f32 %v343_v32, %v5411_v33  ;;  %s5951_s0 = smov (!%p327_p3, %s5094_s0), 5 }
  0x87   : > { %v478_v19 = vand.u32 4294901760, %v5369_v14  ;;  %4444 = vmatprep.subr.mxu0 %v5110_v0  ;;  %v485_v20 = vand.u32 4294901760, %v5373_v15  ;;  %v5437_v40 = vsub.f32 %v342_v34, %v5420_v36  ;;  %v5439_v41 = vand.u32 4294901760, %v340_v38  ;;  %s4271_s30 = sshll.u32 %s5951_s0, 4 }
  0x88   : > { %4445 = vmatpush3.msra.mxu0 %v5357_v6  ;;  %v465_v21 = vsub.f32 %v463_v11, %v464_v16  ;;  %v5384_v22 = vand.u32 4294901760, %v5377_v17  ;;  %v472_v23 = vsub.f32 %v470_v13, %v471_v18  ;;  %v949_v42 = vand.u32 4294901760, %v5425_v37 }
  0x89   : > { %v479_v24 = vsub.f32 %v5369_v14, %v478_v19  ;;  %4446 = vmatprep.subr.mxu0 %v5110_v0  ;;  %v486_v28 = vsub.f32 %v5373_v15, %v485_v20  ;;  %v5446_v43 = vsub.f32 %v341_v35, %v5429_v39  ;;  %v5455_v44 = vsub.f32 %v340_v38, %v5439_v41 }
  0x8a   : > { %4447 = vmatpush3.msra.mxu0 %v5360_v9  ;;  %v466_v25 = vand.u32 4294901760, %v465_v21  ;;  %v430_v26 = vsub.f32 %v5377_v17, %v5384_v22  ;;  %v473_v27 = vand.u32 4294901760, %v472_v23  ;;  %v956_v45 = vand.u32 4294901760, %v5437_v40  ;;  %v350_v21 = vld [vmem:[%s5338_s5 + $0x70] sm:$0xff]  ;;  %v349_v23 = vld [vmem:[%s5338_s5 + $0x68] sm:$0xff] }
  0x8b   : > { %4462 = vmatprep.subr.mxu0 %v5110_v0  ;;  %v480_v30 = vand.u32 4294901760, %v479_v24  ;;  %v487_v31 = vand.u32 4294901760, %v486_v28  ;;  %v950_v46 = vsub.f32 %v5425_v37, %v949_v42  ;;  %v963_v47 = vand.u32 4294901760, %v5446_v43  ;;  %s5867_s14 = scalar_lea.vmem %s5928_s18, %s4271_s30 }
  0x8c   : > { %4452 = vmatpush3.msra.mxu1 %v466_v25  ;;  %v5395_v29 = vand.u32 4294901760, %v430_v26  ;;  %v957_v48 = vsub.f32 %v5437_v40, %v956_v45  ;;  %v970_v49 = vand.u32 4294901760, %v5455_v44  ;;  %v5511_v57 = vand.u32 4294901760, %v347_v56  ;;  %v348_v26 = vld [vmem:[%s5338_s5 + $0x60] sm:$0xff] }
  0x8d   : > { %4453 = vmatprep.subr.mxu1 %v5110_v0  ;;  %v951_v50 = vand.u32 4294901760, %v950_v46  ;;  %v964_v51 = vsub.f32 %v5446_v43, %v963_v47  ;;  %v5522_v60 = vand.u32 4294901760, %v346_v58  ;;  %v5533_v63 = vand.u32 4294901760, %v345_v59 }
  0x8e   : > { %4449 = vmatmul.mubr.f32.vlgmr.msra.gmra.mxu0 %v5395_v29  ;;  %4454 = vmatpush3.msra.mxu1 %v473_v27  ;;  %v958_v52 = vand.u32 4294901760, %v957_v48  ;;  %v971_v53 = vsub.f32 %v5455_v44, %v970_v49  ;;  %v5527_v61 = vsub.f32 %v347_v56, %v5511_v57  ;;  %v5543_v2 = vand.u32 4294901760, %v344_v62 }
  0x8f   : > { %4463 = vmatpush3.msra.mxu0 %v463_v11  ;;  %4455 = vmatprep.subr.mxu1 %v5110_v0  ;;  %v965_v54 = vand.u32 4294901760, %v964_v51  ;;  %v5541_v1 = vsub.f32 %v346_v58, %v5522_v60  ;;  %v5628_v24 = vand.u32 4294901760, %v350_v21  ;;  %v5639_v27 = vand.u32 4294901760, %v349_v23 }
  0x90   : > { %4464 = vmatprep.subr.mxu0 %v5110_v0  ;;  %4456 = vmatpush3.msra.mxu1 %v480_v30  ;;  %v972_v55 = vand.u32 4294901760, %v971_v53  ;;  %v1434_v3 = vand.u32 4294901760, %v5527_v61  ;;  %v5649_v30 = vand.u32 4294901760, %v348_v26  ;;  %vm4097_vm2 = vcmask 18432  }
  0x91   : > { %4465 = vmatpush3.msra.mxu0 %v470_v13  ;;  %4457 = vmatprep.subr.mxu1 %v5110_v0  ;;  %v5647_v28 = vsub.f32 %v350_v21, %v5628_v24  ;;  %v5658_v32 = vsub.f32 %v349_v23, %v5639_v27 }
  0x92   : > { %4466 = vmatprep.subr.mxu0 %v5110_v0  ;;  %4458 = vmatpush3.msra.mxu1 %v487_v31  ;;  %v1435_v7 = vsub.f32 %v5527_v61, %v1434_v3 }
  0x93   : > { %4467 = vmatpush3.msra.mxu0 %v5369_v14  ;;  %4460 = vmatmul.mubr.f32.vlgmr.msra.gmra.mxu1 %v5365_v12  ;;  %v1926_v34 = vand.u32 4294901760, %v5647_v28 }
  0x94   : > { %4468 = vmatprep.subr.mxu0 %v5110_v0  ;;  %4473 = vmatprep.subr.mxu1 %v5110_v0  ;;  %v1436_v11 = vand.u32 4294901760, %v1435_v7 }
  0x95   : > { %4469 = vmatpush3.msra.mxu0 %v5373_v15  ;;  %4470 = vmatprep.mubr.msk.f32.mxu0 %vm5111_vm0, %v5110_v0 }
  0x96   : > { %4474 = vmatpush3.msra.mxu1 %v5353_v4  ;;  %4471 = vmatmul.mubr.f32.vlgmr.msra.gmra.mxu0 %v5377_v17 }
  0x97   : > { %4475 = vmatprep.subr.mxu1 %v5110_v0  ;;  %4484 = vmatprep.subr.mxu0 %v5110_v0 }
  0x98   : > { %4476 = vmatpush3.msra.mxu1 %v5355_v5  ;;  %4485 = vmatpush3.msra.mxu0 %v464_v16 }
  0x99   : > { %4477 = vmatprep.subr.mxu1 %v5110_v0  ;;  %4486 = vmatprep.subr.mxu0 %v5110_v0 }
  0x9a   : > { %4478 = vmatpush3.msra.mxu1 %v5357_v6  ;;  %4487 = vmatpush3.msra.mxu0 %v471_v18 }
  0x9b   : > { %4479 = vmatprep.subr.mxu1 %v5110_v0  ;;  %4488 = vmatprep.subr.mxu0 %v5110_v0 }
  0x9c   : > { %4480 = vmatpush3.msra.mxu1 %v5360_v9  ;;  %4481 = vmatprep.mubr.msk.f32.mxu1 %vm5111_vm0, %v5110_v0 }
  0x9d   : > { %4489 = vmatpush3.msra.mxu0 %v478_v19  ;;  %4482 = vmatmul.mubr.f32.vlgmr.msra.gmra.mxu1 %v5384_v22  ;;  %v351_v19 = vld [vmem:[%s5338_s5 + $0x78] sm:$0xff] }
  0x9e   : > { %4490 = vmatprep.subr.mxu0 %v5110_v0  ;;  %4495 = vmatprep.subr.mxu1 %v5110_v0 }
  0x9f   : > { %4491 = vmatpush3.msra.mxu0 %v485_v20  ;;  %4492 = vmatprep.mubr.msk.f32.mxu0 %vm5111_vm0, %v5110_v0  ;;  %v5617_v20 = vand.u32 4294901760, %v351_v19 }
  0xa0   : > { %4496 = vmatpush3.msra.mxu1 %v5353_v4  ;;  %4493 = vmatmul.mubr.f32.vlgmr.msra.gmra.mxu0 %v5365_v12  ;;  %v5552_v4 = vsub.f32 %v345_v59, %v5533_v63 }
  0xa1   : > { %4497 = vmatprep.subr.mxu1 %v5110_v0  ;;  %4506 = vmatprep.subr.mxu0 %v5110_v0  ;;  %v5633_v25 = vsub.f32 %v351_v19, %v5617_v20 }
  0xa2   : > { %4498 = vmatpush3.msra.mxu1 %v5355_v5  ;;  %4507 = vmatpush3.msra.mxu0 %v5411_v33  ;;  %v5561_v5 = vsub.f32 %v344_v62, %v5543_v2  ;;  %v1448_v8 = vand.u32 4294901760, %v5552_v4 }
  0xa3   : > { %4499 = vmatprep.subr.mxu1 %v5110_v0  ;;  %4508 = vmatprep.subr.mxu0 %v5110_v0  ;;  %v1919_v31 = vand.u32 4294901760, %v5633_v25 }
  0xa4   : > { %4500 = vmatpush3.msra.mxu1 %v5357_v6  ;;  %4509 = vmatpush3.msra.mxu0 %v5420_v36  ;;  %v1441_v6 = vand.u32 4294901760, %v5541_v1  ;;  %v1455_v10 = vand.u32 4294901760, %v5561_v5  ;;  %v1449_v13 = vsub.f32 %v5552_v4, %v1448_v8 }
  0xa5   : > { %4501 = vmatprep.subr.mxu1 %v5110_v0  ;;  %4510 = vmatprep.subr.mxu0 %v5110_v0  ;;  %v1920_v35 = vsub.f32 %v5633_v25, %v1919_v31 }
  0xa6   : > { %4502 = vmatpush3.msra.mxu1 %v5360_v9  ;;  %4503 = vmatprep.mubr.msk.f32.mxu1 %vm5111_vm0, %v5110_v0  ;;  %v1442_v9 = vsub.f32 %v5541_v1, %v1441_v6  ;;  %v1456_v15 = vsub.f32 %v5561_v5, %v1455_v10  ;;  %v1450_v16 = vand.u32 4294901760, %v1449_v13 }
  0xa7   : > { %4511 = vmatpush3.msra.mxu0 %v5429_v39  ;;  %4504 = vmatmul.mubr.f32.vlgmr.msra.gmra.mxu1 %v5365_v12 }
  0xa8   : > { %4512 = vmatprep.subr.mxu0 %v5110_v0  ;;  %4517 = vmatprep.subr.mxu1 %v5110_v0  ;;  %v1443_v14 = vand.u32 4294901760, %v1442_v9  ;;  %v1457_v18 = vand.u32 4294901760, %v1456_v15 }
  0xa9   : > { %4513 = vmatpush3.msra.mxu0 %v5439_v41  ;;  %4518 = vmatpush3.msra.mxu1 %v951_v50 }
  0xaa   : > { %4514 = vmatprep.mubr.msk.f32.mxu0 %vm5111_vm0, %v5110_v0  ;;  %4519 = vmatprep.subr.mxu1 %v5110_v0 }
  0xab   : > { %4528 = vmatprep.subr.mxu0 %v5110_v0  ;;  %4515 = vmatmul.mubr.f32.vlgmr.msra.gmra.mxu0 %v5395_v29 }
  0xac   : > { %4520 = vmatpush3.msra.mxu1 %v958_v52  ;;  %4529 = vmatpush3.msra.mxu0 %v5425_v37  ;;  %v1927_v37 = vsub.f32 %v5647_v28, %v1926_v34 }
  0xad   : > { %4521 = vmatprep.subr.mxu1 %v5110_v0  ;;  %4530 = vmatprep.subr.mxu0 %v5110_v0 }
  0xae   : > { %4522 = vmatpush3.msra.mxu1 %v965_v54  ;;  %4531 = vmatpush3.msra.mxu0 %v5437_v40 }
  0xaf   : > { %4523 = vmatprep.subr.mxu1 %v5110_v0  ;;  %4532 = vmatprep.subr.mxu0 %v5110_v0 }
  0xb0   : > { %4524 = vmatpush3.msra.mxu1 %v972_v55  ;;  %4525 = vmatprep.mubr.msk.f32.mxu1 %vm5111_vm0, %v5110_v0 }
  0xb1   : > { %4533 = vmatpush3.msra.mxu0 %v5446_v43  ;;  %4526 = vmatmul.mubr.f32.vlgmr.msra.gmra.mxu1 %v5365_v12 }
  0xb2   : > { %4534 = vmatprep.subr.mxu0 %v5110_v0  ;;  %4539 = vmatprep.subr.mxu1 %v5110_v0 }
  0xb3   : > { %4535 = vmatpush3.msra.mxu0 %v5455_v44  ;;  %4536 = vmatprep.mubr.msk.f32.mxu0 %vm5111_vm0, %v5110_v0 }
  0xb4   : > { %4540 = vmatpush3.msra.mxu1 %v5411_v33  ;;  %4537 = vmatmul.mubr.f32.vlgmr.msra.gmra.mxu0 %v5377_v17 }
  0xb5   : > { %4541 = vmatprep.subr.mxu1 %v5110_v0  ;;  %4550 = vmatprep.subr.mxu0 %v5110_v0 }
  0xb6   : > { %4542 = vmatpush3.msra.mxu1 %v5420_v36  ;;  %4551 = vmatpush3.msra.mxu0 %v949_v42 }
  0xb7   : > { %4543 = vmatprep.subr.mxu1 %v5110_v0  ;;  %4552 = vmatprep.subr.mxu0 %v5110_v0 }
  0xb8   : > { %4544 = vmatpush3.msra.mxu1 %v5429_v39  ;;  %4553 = vmatpush3.msra.mxu0 %v956_v45 }
  0xb9   : > { %4545 = vmatprep.subr.mxu1 %v5110_v0  ;;  %4554 = vmatprep.subr.mxu0 %v5110_v0 }
  0xba   : > { %4546 = vmatpush3.msra.mxu1 %v5439_v41  ;;  %4547 = vmatprep.mubr.msk.f32.mxu1 %vm5111_vm0, %v5110_v0 }
  0xbb   : > { %4555 = vmatpush3.msra.mxu0 %v963_v47  ;;  %4548 = vmatmul.mubr.f32.vlgmr.msra.gmra.mxu1 %v5384_v22 }
  0xbc   : > { %4556 = vmatprep.subr.mxu0 %v5110_v0  ;;  %4561 = vmatprep.subr.mxu1 %v5110_v0 }
  0xbd   : > { %4557 = vmatpush3.msra.mxu0 %v970_v49  ;;  %4558 = vmatprep.mubr.msk.f32.mxu0 %vm5111_vm0, %v5110_v0 }
  0xbe   : > { %4562 = vmatpush3.msra.mxu1 %v5411_v33  ;;  %4559 = vmatmul.mubr.f32.vlgmr.msra.gmra.mxu0 %v5365_v12  ;;  %v5667_v33 = vsub.f32 %v348_v26, %v5649_v30 }
  0xbf   : > { %4563 = vmatprep.subr.mxu1 %v5110_v0  ;;  %4572 = vmatprep.subr.mxu0 %v5110_v0 }
  0xc0   : > { %4564 = vmatpush3.msra.mxu1 %v5420_v36  ;;  %4573 = vmatpush3.msra.mxu0 %v5511_v57  ;;  %v1933_v36 = vand.u32 4294901760, %v5658_v32  ;;  %v1940_v38 = vand.u32 4294901760, %v5667_v33 }
  0xc1   : > { %4565 = vmatprep.subr.mxu1 %v5110_v0  ;;  %4574 = vmatprep.subr.mxu0 %v5110_v0 }
  0xc2   : > { %4566 = vmatpush3.msra.mxu1 %v5429_v39  ;;  %4575 = vmatpush3.msra.mxu0 %v5522_v60  ;;  %v1921_v39 = vand.u32 4294901760, %v1920_v35  ;;  %v1934_v40 = vsub.f32 %v5658_v32, %v1933_v36  ;;  %v1941_v42 = vsub.f32 %v5667_v33, %v1940_v38 }
  0xc3   : > { %4567 = vmatprep.subr.mxu1 %v5110_v0  ;;  %4576 = vmatprep.subr.mxu0 %v5110_v0 }
  0xc4   : > { %4568 = vmatpush3.msra.mxu1 %v5439_v41  ;;  %4569 = vmatprep.mubr.msk.f32.mxu1 %vm5111_vm0, %v5110_v0  ;;  %v1928_v41 = vand.u32 4294901760, %v1927_v37  ;;  %v1935_v43 = vand.u32 4294901760, %v1934_v40  ;;  %v1942_v44 = vand.u32 4294901760, %v1941_v42 }
  0xc5   : > { %4577 = vmatpush3.msra.mxu0 %v5533_v63  ;;  %4570 = vmatmul.mubr.f32.vlgmr.msra.gmra.mxu1 %v5365_v12 }
  0xc6   : > { %4578 = vmatprep.subr.mxu0 %v5110_v0  ;;  %4583 = vmatprep.subr.mxu1 %v5110_v0 }
  0xc7   : > { %4579 = vmatpush3.msra.mxu0 %v5543_v2  ;;  %4584 = vmatpush3.msra.mxu1 %v1436_v11 }
  0xc8   : > { %4580 = vmatprep.mubr.msk.f32.mxu0 %vm5111_vm0, %v5110_v0  ;;  %4585 = vmatprep.subr.mxu1 %v5110_v0 }
  0xc9   : > { %4594 = vmatprep.subr.mxu0 %v5110_v0  ;;  %4581 = vmatmul.mubr.f32.vlgmr.msra.gmra.mxu0 %v5395_v29 }
  0xca   : > { %4586 = vmatpush3.msra.mxu1 %v1443_v14  ;;  %4595 = vmatpush3.msra.mxu0 %v5527_v61 }
  0xcb   : > { %4587 = vmatprep.subr.mxu1 %v5110_v0  ;;  %4596 = vmatprep.subr.mxu0 %v5110_v0 }
  0xcc   : > { %4588 = vmatpush3.msra.mxu1 %v1450_v16  ;;  %4597 = vmatpush3.msra.mxu0 %v5541_v1 }
  0xcd   : > { %4589 = vmatprep.subr.mxu1 %v5110_v0  ;;  %4598 = vmatprep.subr.mxu0 %v5110_v0 }
  0xce   : > { %4590 = vmatpush3.msra.mxu1 %v1457_v18  ;;  %4591 = vmatprep.mubr.msk.f32.mxu1 %vm5111_vm0, %v5110_v0 }
  0xcf   : > { %4599 = vmatpush3.msra.mxu0 %v5552_v4  ;;  %4592 = vmatmul.mubr.f32.vlgmr.msra.gmra.mxu1 %v5365_v12 }
  0xd0   : > { %4600 = vmatprep.subr.mxu0 %v5110_v0  ;;  %4605 = vmatprep.subr.mxu1 %v5110_v0 }
  0xd1   : > { %4601 = vmatpush3.msra.mxu0 %v5561_v5  ;;  %4602 = vmatprep.mubr.msk.f32.mxu0 %vm5111_vm0, %v5110_v0 }
  0xd2   : > { %4606 = vmatpush3.msra.mxu1 %v5511_v57  ;;  %4603 = vmatmul.mubr.f32.vlgmr.msra.gmra.mxu0 %v5377_v17 }
  0xd3   : > { %4607 = vmatprep.subr.mxu1 %v5110_v0  ;;  %4616 = vmatprep.subr.mxu0 %v5110_v0 }
  0xd4   : > { %4608 = vmatpush3.msra.mxu1 %v5522_v60  ;;  %4617 = vmatpush3.msra.mxu0 %v1434_v3 }
  0xd5   : > { %4609 = vmatprep.subr.mxu1 %v5110_v0  ;;  %4618 = vmatprep.subr.mxu0 %v5110_v0 }
  0xd6   : > { %4610 = vmatpush3.msra.mxu1 %v5533_v63  ;;  %4619 = vmatpush3.msra.mxu0 %v1441_v6 }
  0xd7   : > { %4611 = vmatprep.subr.mxu1 %v5110_v0  ;;  %4620 = vmatprep.subr.mxu0 %v5110_v0 }
  0xd8   : > { %4612 = vmatpush3.msra.mxu1 %v5543_v2  ;;  %4613 = vmatprep.mubr.msk.f32.mxu1 %vm5111_vm0, %v5110_v0 }
  0xd9   : > { %4621 = vmatpush3.msra.mxu0 %v1448_v8  ;;  %4614 = vmatmul.mubr.f32.vlgmr.msra.gmra.mxu1 %v5384_v22 }
  0xda   : > { %4622 = vmatprep.subr.mxu0 %v5110_v0  ;;  %4627 = vmatprep.subr.mxu1 %v5110_v0 }
  0xdb   : > { %4623 = vmatpush3.msra.mxu0 %v1455_v10  ;;  %4624 = vmatprep.mubr.msk.f32.mxu0 %vm5111_vm0, %v5110_v0 }
  0xdc   : > { %4628 = vmatpush3.msra.mxu1 %v5511_v57  ;;  %4625 = vmatmul.mubr.f32.vlgmr.msra.gmra.mxu0 %v5365_v12 }
  0xdd   : > { %4629 = vmatprep.subr.mxu1 %v5110_v0  ;;  %4638 = vmatprep.subr.mxu0 %v5110_v0 }
  0xde   : > { %4630 = vmatpush3.msra.mxu1 %v5522_v60  ;;  %4639 = vmatpush3.msra.mxu0 %v5617_v20 }
  0xdf   : > { %4631 = vmatprep.subr.mxu1 %v5110_v0  ;;  %4640 = vmatprep.subr.mxu0 %v5110_v0 }
  0xe0   : > { %4632 = vmatpush3.msra.mxu1 %v5533_v63  ;;  %4641 = vmatpush3.msra.mxu0 %v5628_v24 }
  0xe1   : > { %4633 = vmatprep.subr.mxu1 %v5110_v0  ;;  %4642 = vmatprep.subr.mxu0 %v5110_v0 }
  0xe2   : > { %4634 = vmatpush3.msra.mxu1 %v5543_v2  ;;  %4635 = vmatprep.mubr.msk.f32.mxu1 %vm5111_vm0, %v5110_v0 }
  0xe3   : > { %4643 = vmatpush3.msra.mxu0 %v5639_v27  ;;  %4636 = vmatmul.mubr.f32.vlgmr.msra.gmra.mxu1 %v5365_v12 }
  0xe4   : > { %4644 = vmatprep.subr.mxu0 %v5110_v0  ;;  %4649 = vmatprep.subr.mxu1 %v5110_v0 }
  0xe5   : > { %4645 = vmatpush3.msra.mxu0 %v5649_v30  ;;  %4650 = vmatpush3.msra.mxu1 %v1921_v39 }
  0xe6   : > { %4646 = vmatprep.mubr.msk.f32.mxu0 %vm5111_vm0, %v5110_v0  ;;  %4651 = vmatprep.subr.mxu1 %v5110_v0 }
  0xe7   : > { %4660 = vmatprep.subr.mxu0 %v5110_v0  ;;  %4647 = vmatmul.mubr.f32.vlgmr.msra.gmra.mxu0 %v5395_v29  ;;  %v353_v29 = vld [vmem:[%s270_s16] sm:$0x7] }
  0xe8   : > { %4652 = vmatpush3.msra.mxu1 %v1928_v41  ;;  %4661 = vmatpush3.msra.mxu0 %v5633_v25  ;;  %v2302_v45 = vsel %vm354_vm1, %v353_v29, 0 }
  0xe9   : > { %4653 = vmatprep.subr.mxu1 %v5110_v0  ;;  %4662 = vmatprep.subr.mxu0 %v5110_v0  ;;  %v5719_v46 = vand.u32 4294901760, %v2302_v45 }
  0xea   : > { %4654 = vmatpush3.msra.mxu1 %v1935_v43  ;;  %4663 = vmatpush3.msra.mxu0 %v5647_v28 }
  0xeb   : > { %4655 = vmatprep.subr.mxu1 %v5110_v0  ;;  %4664 = vmatprep.subr.mxu0 %v5110_v0  ;;  %v5729_v47 = vsub.f32 %v2302_v45, %v5719_v46 }
  0xec   : > { %4656 = vmatpush3.msra.mxu1 %v1942_v44  ;;  %4657 = vmatprep.mubr.msk.f32.mxu1 %vm5111_vm0, %v5110_v0 }
  0xed   : > { %4665 = vmatpush3.msra.mxu0 %v5658_v32  ;;  %4658 = vmatmul.mubr.f32.vlgmr.msra.gmra.mxu1 %v5365_v12 }
  0xee   : > { %4666 = vmatprep.subr.mxu0 %v5110_v0  ;;  %4671 = vmatprep.subr.mxu1 %v5110_v0 }
  0xef   : > { %4667 = vmatpush3.msra.mxu0 %v5667_v33  ;;  %4668 = vmatprep.mubr.msk.f32.mxu0 %vm5111_vm0, %v5110_v0 }
  0xf0   : > { %4672 = vmatpush3.msra.mxu1 %v5617_v20  ;;  %4669 = vmatmul.mubr.f32.vlgmr.msra.gmra.mxu0 %v5377_v17  ;;  %v5740_v17 = vand.u32 4294901760, %v5729_v47 }
  0xf1   : > { %4673 = vmatprep.subr.mxu1 %v5110_v0  ;;  %4682 = vmatprep.subr.mxu0 %v5110_v0 }
  0xf2   : > { %4674 = vmatpush3.msra.mxu1 %v5628_v24  ;;  %4683 = vmatpush3.msra.mxu0 %v1919_v31  ;;  %v2414_v48 = vsub.f32 %v5729_v47, %v5740_v17 }
  0xf3   : > { %4675 = vmatprep.subr.mxu1 %v5110_v0  ;;  %4684 = vmatprep.subr.mxu0 %v5110_v0 }
  0xf4   : > { %4676 = vmatpush3.msra.mxu1 %v5639_v27  ;;  %4685 = vmatpush3.msra.mxu0 %v1926_v34 }
  0xf5   : > { %4677 = vmatprep.subr.mxu1 %v5110_v0  ;;  %4686 = vmatprep.subr.mxu0 %v5110_v0 }
  0xf6   : > { %4678 = vmatpush3.msra.mxu1 %v5649_v30  ;;  %4679 = vmatprep.mubr.msk.f32.mxu1 %vm5111_vm0, %v5110_v0 }
  0xf7   : > { %4687 = vmatpush3.msra.mxu0 %v1933_v36  ;;  %4680 = vmatmul.mubr.f32.vlgmr.msra.gmra.mxu1 %v5384_v22  ;;  %v5759_v22 = vand.u32 4294901760, %v2414_v48 }
  0xf8   : > { %4688 = vmatprep.subr.mxu0 %v5110_v0  ;;  %4693 = vmatprep.subr.mxu1 %v5110_v0 }
  0xf9   : > { %4689 = vmatpush3.msra.mxu0 %v1940_v38  ;;  %4690 = vmatprep.mubr.msk.f32.mxu0 %vm5111_vm0, %v5110_v0 }
  0xfa   : > { %4694 = vmatpush3.msra.mxu1 %v5617_v20  ;;  %4691 = vmatmul.mubr.f32.vlgmr.msra.gmra.mxu0 %v5365_v12 }
  0xfb   : > { %4695 = vmatprep.subr.mxu1 %v5110_v0  ;;  %4701 = vmatprep.mubr.msk.f32.mxu1 %vm5111_vm0, %v5110_v0 }
  0xfc   : > { %4696 = vmatpush3.msra.mxu1 %v5628_v24  ;;  %4704 = vmatprep.subr.mxu0 %v5110_v0 }
  0xfd   : > { %4697 = vmatprep.subr.mxu1 %v5110_v0  ;;  %4705 = vmatpush3.xpose.msra.mxu0 %v5719_v46 }
  0xfe   : > { %4698 = vmatpush3.msra.mxu1 %v5639_v27  ;;  %4706 = vmatprep.mubr.msk.f32.mxu0 %vm5111_vm0, %v5110_v0 }
  0xff   : > { %4699 = vmatprep.subr.mxu1 %v5110_v0  ;;  %4714 = vmatprep.subr.mxu0 %v5110_v0 }
 0x100   : > { %4700 = vmatpush3.msra.mxu1 %v5649_v30 }
 0x101   : > { %4702 = vmatmul.mubr.f32.vlgmr.msra.gmra.mxu1 %v5365_v12  ;;  %4709 = vmatprep.subr.mxu1 %v5110_v0 }
 0x102   : > { %4710 = vmatpush3.xpose.msra.mxu1 %v5759_v22  ;;  %4711 = vmatprep.mubr.msk.f32.mxu1 %vm5111_vm0, %v5110_v0 }
 0x103   : > { %4719 = vmatprep.subr.mxu1 %v5110_v0 }
 0x14e   : > { %v433_v49 = vpop.f32.mrf.mxu0 }
 0x150   : > { %v4450_v50 = vpop.f32.mrf.mxu0 }
 0x153   : > { %v524_v51 = vpop.f32.mrf.mxu1 }
 0x154   : > { %v525_v55 = vadd.f32 %v524_v51, %v433_v49 }
 0x155   : > { %v4461_v52 = vpop.f32.mrf.mxu1 }
 0x156   : > { %v604_v53 = vpop.f32.mrf.mxu0 }
 0x157   : > { %v605_v58 = vadd.f32 %v604_v53, %v525_v55 }
 0x158   : > { %v4472_v54 = vpop.f32.mrf.mxu0 }
 0x15d   : > { %v681_v56 = vpop.f32.mrf.mxu1 }
 0x15e   : > { %v682_v59 = vadd.f32 %v681_v56, %v605_v58 }
 0x15f   : > { %v4483_v57 = vpop.f32.mrf.mxu1 }
 0x160   : > { %v764_v12 = vpop.f32.mrf.mxu0 }
 0x161   : > { %v765_v61 = vadd.f32 %v764_v12, %v682_v59 }
 0x162   : > { %v4494_v60 = vpop.f32.mrf.mxu0 }
 0x167   : > { %v839_v62 = vpop.f32.mrf.mxu1 }
 0x168   : > { %v840_v63 = vadd.f32 %v839_v62, %v765_v61 }
 0x169   : > { %v4505_v1 = vpop.f32.mrf.mxu1 }
 0x16a   : > { %v2299_v2 = vsel %vm354_vm1, %v840_v63, 0 }
 0x16b   : > { %v2370_v3 = vand.u32 4294901760, %v2299_v2  ;;  %v918_v4 = vpop.f32.mrf.mxu0 }
 0x16d   : > { %v2371_v5 = vsub.f32 %v2299_v2, %v2370_v3  ;;  %4712 = vmatmul.mubr.f32.vlgmr.msra.gmra.mxu1 %v2370_v3  ;;  %v4516_v6 = vpop.f32.mrf.mxu0 }
 0x16e   : > { %4720 = vmatpush3.xpose.msra.mxu1 %v5719_v46  ;;  %4721 = vmatprep.mubr.msk.f32.mxu1 %vm5111_vm0, %v5110_v0 }
 0x16f   : > { %v2372_v7 = vand.u32 4294901760, %v2371_v5  ;;  %4729 = vmatprep.subr.mxu1 %v5110_v0 }
 0x171   : > { %v1009_v8 = vpop.f32.mrf.mxu1  ;;  %4722 = vmatmul.mubr.f32.vlgmr.msra.gmra.mxu1 %v2372_v7  ;;  %v2373_v9 = vsub.f32 %v2371_v5, %v2372_v7 }
 0x172   : > { %4730 = vmatpush3.xpose.msra.mxu1 %v5719_v46  ;;  %4731 = vmatprep.mubr.msk.f32.mxu1 %vm5111_vm0, %v5110_v0  ;;  %v1010_v15 = vadd.f32 %v1009_v8, %v918_v4 }
 0x173   : > { %v4527_v10 = vpop.f32.mrf.mxu1  ;;  %v2374_v11 = vand.u32 4294901760, %v2373_v9  ;;  %4739 = vmatprep.subr.mxu1 %v5110_v0 }
 0x174   : > { %v1089_v13 = vpop.f32.mrf.mxu0 }
 0x175   : > { %4707 = vmatmul.mubr.f32.vlgmr.msra.gmra.mxu0 %v2374_v11  ;;  %4732 = vmatmul.mubr.f32.vlgmr.msra.gmra.mxu1 %v2370_v3  ;;  %v1090_v19 = vadd.f32 %v1089_v13, %v1010_v15 }
 0x176   : > { %v4538_v14 = vpop.f32.mrf.mxu0  ;;  %4715 = vmatpush3.xpose.msra.mxu0 %v5729_v47  ;;  %4716 = vmatprep.mubr.msk.f32.mxu0 %vm5111_vm0, %v5110_v0 }
 0x177   : > { %4724 = vmatprep.subr.mxu0 %v5110_v0  ;;  %4740 = vmatpush3.xpose.msra.mxu1 %v5759_v22 }
 0x178   : > { %4741 = vmatprep.mubr.msk.f32.mxu1 %vm5111_vm0, %v5110_v0  ;;  %4749 = vmatprep.subr.mxu1 %v5110_v0 }
 0x179   : > { %4717 = vmatmul.mubr.f32.vlgmr.msra.gmra.mxu0 %v2371_v5 }
 0x17a   : > { %4725 = vmatpush3.xpose.msra.mxu0 %v5740_v17  ;;  %4726 = vmatprep.mubr.msk.f32.mxu0 %vm5111_vm0, %v5110_v0 }
 0x17b   : > { %v1166_v16 = vpop.f32.mrf.mxu1  ;;  %4734 = vmatprep.subr.mxu0 %v5110_v0 }
 0x17c   : > { %v1167_v21 = vadd.f32 %v1166_v16, %v1090_v19 }
 0x17d   : > { %v4549_v18 = vpop.f32.mrf.mxu1  ;;  %4727 = vmatmul.mubr.f32.vlgmr.msra.gmra.mxu0 %v2370_v3 }
 0x17e   : > { %v1249_v20 = vpop.f32.mrf.mxu0  ;;  %4735 = vmatpush3.xpose.msra.mxu0 %v5719_v46  ;;  %4736 = vmatprep.mubr.msk.f32.mxu0 %vm5111_vm0, %v5110_v0 }
 0x17f   : > { %4744 = vmatprep.subr.mxu0 %v5110_v0  ;;  %v1250_v24 = vadd.f32 %v1249_v20, %v1167_v21 }
 0x180   : > { %v4560_v23 = vpop.f32.mrf.mxu0 }
 0x185   : > { %v1324_v25 = vpop.f32.mrf.mxu1 }
 0x186   : > { %v1325_v26 = vadd.f32 %v1324_v25, %v1250_v24 }
 0x187   : > { %v4571_v27 = vpop.f32.mrf.mxu1 }
 0x188   : > { %v2751_v28 = vsel %vm354_vm1, %v1325_v26, 0 }
 0x189   : > { %v2819_v30 = vand.u32 4294901760, %v2751_v28  ;;  %v1403_v31 = vpop.f32.mrf.mxu0 }
 0x18b   : > { %v2820_v32 = vsub.f32 %v2751_v28, %v2819_v30  ;;  %4742 = vmatmul.mubr.f32.vlgmr.msra.gmra.mxu1 %v2819_v30  ;;  %v4582_v33 = vpop.f32.mrf.mxu0 }
 0x18c   : > { %4750 = vmatpush3.xpose.msra.mxu1 %v5719_v46  ;;  %4751 = vmatprep.mubr.msk.f32.mxu1 %vm5111_vm0, %v5110_v0 }
 0x18d   : > { %v2821_v34 = vand.u32 4294901760, %v2820_v32  ;;  %4759 = vmatprep.subr.mxu1 %v5110_v0 }
 0x18f   : > { %v1494_v35 = vpop.f32.mrf.mxu1  ;;  %4752 = vmatmul.mubr.f32.vlgmr.msra.gmra.mxu1 %v2821_v34  ;;  %v2822_v36 = vsub.f32 %v2820_v32, %v2821_v34 }
 0x190   : > { %4760 = vmatpush3.xpose.msra.mxu1 %v5719_v46  ;;  %4761 = vmatprep.mubr.msk.f32.mxu1 %vm5111_vm0, %v5110_v0  ;;  %v1495_v41 = vadd.f32 %v1494_v35, %v1403_v31 }
 0x191   : > { %v4593_v37 = vpop.f32.mrf.mxu1  ;;  %v2823_v38 = vand.u32 4294901760, %v2822_v36  ;;  %4769 = vmatprep.subr.mxu1 %v5110_v0 }
 0x192   : > { %v1574_v39 = vpop.f32.mrf.mxu0 }
 0x193   : > { %4737 = vmatmul.mubr.f32.vlgmr.msra.gmra.mxu0 %v2823_v38  ;;  %4762 = vmatmul.mubr.f32.vlgmr.msra.gmra.mxu1 %v2819_v30  ;;  %v1575_v44 = vadd.f32 %v1574_v39, %v1495_v41 }
 0x194   : > { %v4604_v40 = vpop.f32.mrf.mxu0  ;;  %4745 = vmatpush3.xpose.msra.mxu0 %v5729_v47  ;;  %4746 = vmatprep.mubr.msk.f32.mxu0 %vm5111_vm0, %v5110_v0 }
 0x195   : > { %4754 = vmatprep.subr.mxu0 %v5110_v0  ;;  %4770 = vmatpush3.xpose.msra.mxu1 %v5759_v22 }
 0x196   : > { %4771 = vmatprep.mubr.msk.f32.mxu1 %vm5111_vm0, %v5110_v0  ;;  %4779 = vmatprep.subr.mxu1 %v5110_v0 }
 0x197   : > { %4747 = vmatmul.mubr.f32.vlgmr.msra.gmra.mxu0 %v2820_v32 }
 0x198   : > { %4755 = vmatpush3.xpose.msra.mxu0 %v5740_v17  ;;  %4756 = vmatprep.mubr.msk.f32.mxu0 %vm5111_vm0, %v5110_v0 }
 0x199   : > { %v1651_v42 = vpop.f32.mrf.mxu1  ;;  %4764 = vmatprep.subr.mxu0 %v5110_v0 }
 0x19a   : > { %v1652_v45 = vadd.f32 %v1651_v42, %v1575_v44 }
 0x19b   : > { %v4615_v43 = vpop.f32.mrf.mxu1  ;;  %4757 = vmatmul.mubr.f32.vlgmr.msra.gmra.mxu0 %v2819_v30 }
 0x19c   : > { %v1734_v29 = vpop.f32.mrf.mxu0  ;;  %4765 = vmatpush3.xpose.msra.mxu0 %v5719_v46  ;;  %4766 = vmatprep.mubr.msk.f32.mxu0 %vm5111_vm0, %v5110_v0 }
 0x19d   : > { %4774 = vmatprep.subr.mxu0 %v5110_v0  ;;  %v1735_v49 = vadd.f32 %v1734_v29, %v1652_v45 }
 0x19e   : > { %v4626_v48 = vpop.f32.mrf.mxu0 }
 0x1a3   : > { %v1809_v50 = vpop.f32.mrf.mxu1 }
 0x1a4   : > { %v1810_v51 = vadd.f32 %v1809_v50, %v1735_v49 }
 0x1a5   : > { %v4637_v52 = vpop.f32.mrf.mxu1 }
 0x1a6   : > { %v3200_v53 = vsel %vm354_vm1, %v1810_v51, 0 }
 0x1a7   : > { %v3268_v54 = vand.u32 4294901760, %v3200_v53  ;;  %v1888_v55 = vpop.f32.mrf.mxu0 }
 0x1a9   : > { %v3269_v56 = vsub.f32 %v3200_v53, %v3268_v54  ;;  %4772 = vmatmul.mubr.f32.vlgmr.msra.gmra.mxu1 %v3268_v54  ;;  %v4648_v57 = vpop.f32.mrf.mxu0 }
 0x1aa   : > { %4780 = vmatpush3.xpose.msra.mxu1 %v5719_v46  ;;  %4781 = vmatprep.mubr.msk.f32.mxu1 %vm5111_vm0, %v5110_v0 }
 0x1ab   : > { %v3270_v58 = vand.u32 4294901760, %v3269_v56  ;;  %4789 = vmatprep.subr.mxu1 %v5110_v0 }
 0x1ad   : > { %v1979_v12 = vpop.f32.mrf.mxu1  ;;  %4782 = vmatmul.mubr.f32.vlgmr.msra.gmra.mxu1 %v3270_v58  ;;  %v3271_v59 = vsub.f32 %v3269_v56, %v3270_v58 }
 0x1ae   : > { %4790 = vmatpush3.xpose.msra.mxu1 %v5719_v46  ;;  %4791 = vmatprep.mubr.msk.f32.mxu1 %vm5111_vm0, %v5110_v0  ;;  %v1980_v1 = vadd.f32 %v1979_v12, %v1888_v55 }
 0x1af   : > { %v4659_v60 = vpop.f32.mrf.mxu1  ;;  %v3272_v61 = vand.u32 4294901760, %v3271_v59  ;;  %4799 = vmatprep.subr.mxu1 %v5110_v0 }
 0x1b0   : > { %v2059_v62 = vpop.f32.mrf.mxu0 }
 0x1b1   : > { %4767 = vmatmul.mubr.f32.vlgmr.msra.gmra.mxu0 %v3272_v61  ;;  %4792 = vmatmul.mubr.f32.vlgmr.msra.gmra.mxu1 %v3268_v54  ;;  %v2060_v4 = vadd.f32 %v2059_v62, %v1980_v1 }
 0x1b2   : > { %v4670_v63 = vpop.f32.mrf.mxu0  ;;  %4775 = vmatpush3.xpose.msra.mxu0 %v5729_v47  ;;  %4776 = vmatprep.mubr.msk.f32.mxu0 %vm5111_vm0, %v5110_v0 }
 0x1b3   : > { %4784 = vmatprep.subr.mxu0 %v5110_v0  ;;  %4800 = vmatpush3.xpose.msra.mxu1 %v5759_v22 }
 0x1b4   : > { %4801 = vmatprep.mubr.msk.f32.mxu1 %vm5111_vm0, %v5110_v0  ;;  %4809 = vmatprep.subr.mxu1 %v5110_v0 }
 0x1b5   : > { %4777 = vmatmul.mubr.f32.vlgmr.msra.gmra.mxu0 %v3269_v56 }
 0x1b6   : > { %4785 = vmatpush3.xpose.msra.mxu0 %v5740_v17  ;;  %4786 = vmatprep.mubr.msk.f32.mxu0 %vm5111_vm0, %v5110_v0 }
 0x1b7   : > { %v2136_v2 = vpop.f32.mrf.mxu1  ;;  %4794 = vmatprep.subr.mxu0 %v5110_v0 }
 0x1b8   : > { %v2137_v22 = vadd.f32 %v2136_v2, %v2060_v4 }
 0x1b9   : > { %v4681_v3 = vpop.f32.mrf.mxu1  ;;  %4787 = vmatmul.mubr.f32.vlgmr.msra.gmra.mxu0 %v3268_v54 }
 0x1ba   : > { %v2219_v5 = vpop.f32.mrf.mxu0  ;;  %4795 = vmatpush3.xpose.msra.mxu0 %v5719_v46  ;;  %4796 = vmatprep.mubr.msk.f32.mxu0 %vm5111_vm0, %v5110_v0 }
 0x1bb   : > { %4804 = vmatprep.subr.mxu0 %v5110_v0  ;;  %v2220_v7 = vadd.f32 %v2219_v5, %v2137_v22 }
 0x1bc   : > { %v4692_v6 = vpop.f32.mrf.mxu0 }
 0x1c1   : > { %v2294_v8 = vpop.f32.mrf.mxu1 }
 0x1c2   : > { %v2295_v9 = vadd.f32 %v2294_v8, %v2220_v7 }
 0x1c3   : > { %v4703_v10 = vpop.f32.mrf.mxu1 }
 0x1c4   : > { %v3649_v11 = vsel %vm354_vm1, %v2295_v9, 0 }
 0x1c5   : > { %v3717_v13 = vand.u32 4294901760, %v3649_v11 }
 0x1c7   : > { %v3718_v14 = vsub.f32 %v3649_v11, %v3717_v13  ;;  %4802 = vmatmul.mubr.f32.vlgmr.msra.gmra.mxu1 %v3717_v13 }
 0x1c8   : > { %4810 = vmatpush3.xpose.msra.mxu1 %v5719_v46  ;;  %4811 = vmatprep.mubr.msk.f32.mxu1 %vm5111_vm0, %v5110_v0 }
 0x1c9   : > { %v3719_v15 = vand.u32 4294901760, %v3718_v14  ;;  %4819 = vmatprep.subr.mxu1 %v5110_v0 }
 0x1cb   : > { %4812 = vmatmul.mubr.f32.vlgmr.msra.gmra.mxu1 %v3719_v15  ;;  %v3720_v16 = vsub.f32 %v3718_v14, %v3719_v15 }
 0x1cc   : > { %4820 = vmatpush3.xpose.msra.mxu1 %v5719_v46  ;;  %4821 = vmatprep.mubr.msk.f32.mxu1 %vm5111_vm0, %v5110_v0 }
 0x1cd   : > { %v3721_v18 = vand.u32 4294901760, %v3720_v16 }
 0x1cf   : > { %4797 = vmatmul.mubr.f32.vlgmr.msra.gmra.mxu0 %v3721_v18  ;;  %4822 = vmatmul.mubr.f32.vlgmr.msra.gmra.mxu1 %v3717_v13 }
 0x1d0   : > { %4805 = vmatpush3.xpose.msra.mxu0 %v5729_v47  ;;  %4806 = vmatprep.mubr.msk.f32.mxu0 %vm5111_vm0, %v5110_v0 }
 0x1d1   : > { %4814 = vmatprep.subr.mxu0 %v5110_v0 }
 0x1d3   : > { %4807 = vmatmul.mubr.f32.vlgmr.msra.gmra.mxu0 %v3718_v14 }
 0x1d4   : > { %4815 = vmatpush3.xpose.msra.mxu0 %v5740_v17  ;;  %4816 = vmatprep.mubr.msk.f32.mxu0 %vm5111_vm0, %v5110_v0 }
 0x1d7   : > { %4817 = vmatmul.mubr.f32.vlgmr.msra.gmra.mxu0 %v3717_v13 }
 0x22d   : > { %v2452_v46 = vpop.f32.mrf.mxu1 }
 0x22f   : > { %v4713_v19 = vpop.f32.mrf.mxu1 }
 0x231   : > { %v2600_v20 = vpop.f32.mrf.mxu1 }
 0x233   : > { %v4723_v21 = vpop.f32.mrf.mxu1 }
 0x235   : > { %v2376_v23 = vpop.f32.mrf.mxu0  ;;  %v2746_v47 = vpop.f32.mrf.mxu1 }
 0x236   : > { %v2453_v26 = vadd.f32 %v2452_v46, %v2376_v23 }
 0x237   : > { %v4708_v24 = vpop.f32.mrf.mxu0  ;;  %v4733_v25 = vpop.f32.mrf.mxu1 }
 0x239   : > { %v2526_v27 = vpop.f32.mrf.mxu0 }
 0x23a   : > { %v2527_v28 = vadd.f32 %v2526_v27, %v2453_v26 }
 0x23b   : > { %v4718_v30 = vpop.f32.mrf.mxu0 }
 0x23c   : > { %v2601_v17 = vadd.f32 %v2600_v20, %v2527_v28 }
 0x23d   : > { %v2674_v31 = vpop.f32.mrf.mxu0 }
 0x23e   : > { %v2675_v32 = vadd.f32 %v2674_v31, %v2601_v17 }
 0x23f   : > { %v4728_v0 = vpop.f32.mrf.mxu0 }
 0x240   : > { %v2747_v33 = vadd.f32 %v2746_v47, %v2675_v32 }
 0x242   : > { %4098 = vst.msk [vmem:[%s5867_s14] sm:$0x7] %vm4097_vm2, %v2747_v33 }
 0x24b   : > { %v2901_v34 = vpop.f32.mrf.mxu1 }
 0x24d   : > { %v4743_v35 = vpop.f32.mrf.mxu1 }
 0x24f   : > { %v3049_v36 = vpop.f32.mrf.mxu1 }
 0x251   : > { %v4753_v37 = vpop.f32.mrf.mxu1 }
 0x253   : > { %v2825_v38 = vpop.f32.mrf.mxu0  ;;  %v3195_v39 = vpop.f32.mrf.mxu1 }
 0x254   : > { %v2902_v42 = vadd.f32 %v2901_v34, %v2825_v38 }
 0x255   : > { %v4738_v40 = vpop.f32.mrf.mxu0  ;;  %v4763_v41 = vpop.f32.mrf.mxu1 }
 0x257   : > { %v2975_v43 = vpop.f32.mrf.mxu0 }
 0x258   : > { %v2976_v44 = vadd.f32 %v2975_v43, %v2902_v42 }
 0x259   : > { %v4748_v29 = vpop.f32.mrf.mxu0 }
 0x25a   : > { %v3050_v45 = vadd.f32 %v3049_v36, %v2976_v44 }
 0x25b   : > { %v3123_v48 = vpop.f32.mrf.mxu0 }
 0x25c   : > { %v3124_v49 = vadd.f32 %v3123_v48, %v3050_v45 }
 0x25d   : > { %v4758_v50 = vpop.f32.mrf.mxu0 }
 0x25e   : > { %v3196_v51 = vadd.f32 %v3195_v39, %v3124_v49 }
 0x260   : > { %4099 = vst.msk [vmem:[%s5867_s14 + $0x4] sm:$0x7] %vm4097_vm2, %v3196_v51 }
 0x269   : > { %v3350_v52 = vpop.f32.mrf.mxu1 }
 0x26b   : > { %v4773_v53 = vpop.f32.mrf.mxu1 }
 0x26d   : > { %v3498_v54 = vpop.f32.mrf.mxu1 }
 0x26f   : > { %v4783_v55 = vpop.f32.mrf.mxu1 }
 0x271   : > { %v3274_v56 = vpop.f32.mrf.mxu0  ;;  %v3644_v57 = vpop.f32.mrf.mxu1 }
 0x272   : > { %v3351_v59 = vadd.f32 %v3350_v52, %v3274_v56 }
 0x273   : > { %v4768_v58 = vpop.f32.mrf.mxu0  ;;  %v4793_v12 = vpop.f32.mrf.mxu1 }
 0x275   : > { %v3424_v60 = vpop.f32.mrf.mxu0 }
 0x276   : > { %v3425_v61 = vadd.f32 %v3424_v60, %v3351_v59 }
 0x277   : > { %v4778_v62 = vpop.f32.mrf.mxu0 }
 0x278   : > { %v3499_v63 = vadd.f32 %v3498_v54, %v3425_v61 }
 0x279   : > { %v3572_v1 = vpop.f32.mrf.mxu0 }
 0x27a   : > { %v3573_v2 = vadd.f32 %v3572_v1, %v3499_v63 }
 0x27b   : > { %v4788_v3 = vpop.f32.mrf.mxu0 }
 0x27c   : > { %v3645_v4 = vadd.f32 %v3644_v57, %v3573_v2 }
 0x27e   : > { %4100 = vst.msk [vmem:[%s5867_s14 + $0x8] sm:$0x7] %vm4097_vm2, %v3645_v4 }
 0x287   : > { %v3799_v5 = vpop.f32.mrf.mxu1 }
 0x289   : > { %v4803_v22 = vpop.f32.mrf.mxu1 }
 0x28b   : > { %v3947_v6 = vpop.f32.mrf.mxu1 }
 0x28d   : > { %v4813_v7 = vpop.f32.mrf.mxu1 }
 0x28f   : > { %v3723_v8 = vpop.f32.mrf.mxu0  ;;  %v4093_v9 = vpop.f32.mrf.mxu1 }
 0x290   : > { %v3800_v13 = vadd.f32 %v3799_v5, %v3723_v8 }
 0x291   : > { %v4798_v10 = vpop.f32.mrf.mxu0  ;;  %v4823_v11 = vpop.f32.mrf.mxu1 }
 0x293   : > { %v3873_v14 = vpop.f32.mrf.mxu0 }
 0x294   : > { %v3874_v15 = vadd.f32 %v3873_v14, %v3800_v13 }
 0x295   : > { %v4808_v16 = vpop.f32.mrf.mxu0 }
 0x296   : > { %v3948_v18 = vadd.f32 %v3947_v6, %v3874_v15 }
 0x297   : > { %v4021_v46 = vpop.f32.mrf.mxu0 }
 0x298   : > { %v4022_v19 = vadd.f32 %v4021_v46, %v3948_v18 }
 0x299   : > { %v4818_v20 = vpop.f32.mrf.mxu0 }
 0x29a   : > { %v4094_v21 = vadd.f32 %v4093_v9, %v4022_v19 }
 0x29c   : > { %4101 = vst.msk [vmem:[%s5867_s14 + $0xc] sm:$0x7] %vm4097_vm2, %v4094_v21 }
 0x29d PF: > { %s24_s25 = sadd.s32 1, %s5102_s25   ;;  %s5929_s0 = sld [smem:[#allocation17_spill]] }
 0x29e   : > { %p21_p1 = scmp.ge.s32.totalorder %s24_s25, 8   ;;  %s5930_s18 = smov %s5074_s19 }
 0x29f   : > { %s5931_s19 = smov %s5078_s20  ;;  %s5932_s20 = smov %s5278_s6 }
 0x2a0   : > { %s5933_s21 = smov %s5086_s22  ;;  %s5934_s22 = smov %s5090_s23 }
 0x2a1   :  { %23 = sbr.rel (!%p21_p1) target bundleno = 15 (0xf), region = 96 }
 0x2a3   : > { %s5935_s23 = smov %s5929_s0  ;;  %s5936_s0 = smov %s5098_s24 }
 0x2a4   : > { %s5937_s24 = smov %s5939_s26 }
 0x2a6   :  { %4132 = vsyncpa [#allocation5], 1 }
 0x2a7   :  { %4134 = vsyncpa [#allocation5 + $0x1], 1 }
 0x2a8   :  { %4135 = vsyncpa [#allocation7], 1 }
 0x2a9   :  { %4137 = vsyncpa [#allocation7 + $0x1], 1 }

</bundles_post_ra>
